<compile_context>
chip_gen: v7x
topology: tpu7x:2x2x1
jax: 0.10.0
libtpu: 0.0.40
codegen_flags: <defaults>
</compile_context>

<pallas_src>
import functools

import jax
import jax.numpy as jnp
from jax.experimental import pallas as pl
from jax.experimental.pallas import tpu as pltpu

BN_EPS = 1e-5


# --------------------------------------------------------------------------- #
# Kernel (transposed problem: lane axis = flattened rows M)
#   x_ref   : (L, TM)        streamed block of x_past^T,  L = W + H
#   w1_ref  : (width, L)     FC1 weight (BN folded, zero-padded over H cols)
#   b1_ref  : (width, 1)     FC1 bias   (BN folded), f32
#   w2_ref  : (width, width) FC2 weight (BN folded)
#   b2_ref  : (width, 1)
#   rest    : fused    -> (wout_ref (L, width), out_ref)
#             two-stage-> (wcat_ref (2td, width), basis_ref (L, 2td), out_ref)
#   out_ref : (L, TM)        block_out^T + x^T
# --------------------------------------------------------------------------- #
def _nbeats_kernel(two_stage, compute_dtype,
                   x_ref, w1_ref, b1_ref, w2_ref, b2_ref, *rest):
    if two_stage:
        wcat_ref, basis_ref, out_ref = rest
    else:
        wout_ref, out_ref = rest

    xT = x_ref[...]                                         # (L, TM) f32

    # FC1: Linear (+ folded eval-BN) -> ReLU   (dropout = identity in eval).
    # w1 is zero-padded over the horizon columns, so the full tile is consumed
    # with no lane/sublane slice.
    h = jnp.dot(w1_ref[...], xT.astype(compute_dtype),
                preferred_element_type=jnp.float32) + b1_ref[...]
    h = jnp.maximum(h, 0.0)

    # FC2
    h = jnp.dot(w2_ref[...], h.astype(compute_dtype),
                preferred_element_type=jnp.float32) + b2_ref[...]
    h = jnp.maximum(h, 0.0).astype(compute_dtype)

    # Trend heads (negate + concat folded into the weight matrices)
    if two_stage:
        theta = jnp.dot(wcat_ref[...], h,
                        preferred_element_type=jnp.float32).astype(compute_dtype)
        block = jnp.dot(basis_ref[...], theta, preferred_element_type=jnp.float32)
    else:
        block = jnp.dot(wout_ref[...], h, preferred_element_type=jnp.float32)

    out_ref[...] = (block + xT).astype(out_ref.dtype)       # residual add


# --------------------------------------------------------------------------- #
# Trace-time helpers
# --------------------------------------------------------------------------- #
def _fold_bn(w, b, bn):
    """Fold eval-mode BatchNorm1d (and Linear bias) into the Linear weights."""
    g, be, rm, rv = bn[0:1], bn[1:2], bn[2:3], bn[3:4]       # each (1, n)
    s = g * jax.lax.rsqrt(rv + BN_EPS)
    return w * s, (b - rm) * s + be


def _vmem_limit_bytes():
    """Generation-aware VMEM budget: physical VMEM minus headroom."""
    phys = 64 * 1024 * 1024
    try:
        info = pltpu.get_tpu_info()
        phys = int(getattr(info, "vmem_capacity_bytes", phys))
    except Exception:
        pass
    # >=16 MiB headroom for Mosaic scratch/spill; cap at 100 MiB on 128-MiB parts.
    return int(min(max(phys - 16 * 1024 * 1024, 32 * 1024 * 1024),
                   100 * 1024 * 1024))


def _pick_tile_cols(M, L, width, td, two_stage, compute_itemsize,
                    vmem_limit, weight_bytes, buffer_count):
    """Pick the lane-tile TM from a per-column byte budget (not a fixed count)."""
    if M <= 128:
        return M                     # lane dim must equal full dim when < 128
    per_col = (
        buffer_count * L * 4         # streamed x^T block (f32), multi-buffered
        + buffer_count * L * 4       # streamed out^T block (f32)
        + L * compute_itemsize       # x cast for the FC1 matmul
        + 2 * width * 4              # up to two live f32 FC activations
        + width * compute_itemsize   # activation cast for the next matmul
        + L * 4                      # block_out before the residual add
    )
    if two_stage:
        per_col += 2 * td * (4 + compute_itemsize)
    budget = max(vmem_limit - 2 * weight_bytes - 8 * 1024 * 1024,
                 4 * 1024 * 1024)
    tm = int(budget // int(per_col * 1.5))     # 1.5x slack for Mosaic temps
    # keep >=4 grid steps so dimension_semantics=("parallel",) can shard rows
    # across v7x's two TensorCores (harmless on single-TC v5e/v6e)
    tm = min(tm, max(128, ((M // 4) // 128) * 128))
    tm = min(tm, M)
    return max(128, (tm // 128) * 128)


# --------------------------------------------------------------------------- #
# Wrapper
# --------------------------------------------------------------------------- #
def nbeats_forward_pallas(x_past, params, window_size, *,
                          use_bf16=True, head_mode="auto", buffer_count=2):
    """x_past: (B, N, W+H) float32.  params: dict of raw (unfolded) weights."""
    B, N, L = x_past.shape
    H = L - window_size
    M = B * N
    width = params["w1"].shape[1]
    td = params["wb"].shape[1]
    cdt = jnp.bfloat16 if use_bf16 else jnp.float32

    # ---- weight preprocessing (runs once under jit) ----------------------- #
    w1, b1 = _fold_bn(params["w1"], params["b1"], params["bn1"])   # (W,width)
    w2, b2 = _fold_bn(params["w2"], params["b2"], params["bn2"])
    # zero-pad FC1 over the horizon rows -> kernel consumes the full (L, TM) tile
    w1 = jnp.concatenate([w1, jnp.zeros((H, width), w1.dtype)], axis=0)
    w1T = w1.T.astype(cdt)                        # (width, L)
    w2T = w2.T.astype(cdt)                        # (width, width)
    b1c = b1.T.astype(jnp.float32)                # (width, 1), f32 accumulate
    b2c = b2.T.astype(jnp.float32)

    # Trend heads: fused (single (L,width) matrix) vs two-stage, picked by MXU
    # cost.  Two-stage wins when thetas_dim << W+H (typical trend polynomials).
    if head_mode == "auto":
        two_stage = 2 * td * (width + L) < width * L
    else:
        two_stage = head_mode == "two_stage"

    if two_stage:
        wcatT = jnp.concatenate([params["wb"].T, params["wf"].T],
                                axis=0).astype(cdt)            # (2td, width)
        basis = jnp.zeros((L, 2 * td), jnp.float32)
        basis = basis.at[:window_size, :td].set(-params["basis_b"].T)
        basis = basis.at[window_size:, td:].set(params["basis_f"].T)
        head_ws = (wcatT, basis.astype(cdt))                    # (L, 2td)
        head_flops = 2 * M * (width * 2 * td + 2 * td * L)
    else:
        w_out = jnp.concatenate([-(params["wb"] @ params["basis_b"]),
                                 params["wf"] @ params["basis_f"]], axis=1)
        head_ws = (w_out.T.astype(cdt),)                        # (L, width)
        head_flops = 2 * M * width * L

    weights = (w1T, b1c, w2T, b2c) + head_ws
    weight_bytes = sum(int(w.size) * w.dtype.itemsize for w in weights)

    # ---- lane-dense layout: big M axis is the lane axis ------------------- #
    # TODO(synk): plumbing transposes; callers holding (L, M) activations skip them.
    xT = x_past.reshape(M, L).T                                  # (L, M)

    vmem_limit = _vmem_limit_bytes()
    tm = _pick_tile_cols(M, L, width, td, two_stage,
                         2 if use_bf16 else 4,
                         vmem_limit, weight_bytes, buffer_count)
    grid = (pl.cdiv(M, tm),)        # ragged last block allowed (masked stores)

    def stream_spec():
        # bump buffer_count to 3 if profiling shows exposed DMA (sweep 2 vs 3)
        if buffer_count != 2:
            return pl.BlockSpec((L, tm), lambda i: (0, i),
                                pipeline_mode=pl.Buffered(buffer_count))
        return pl.BlockSpec((L, tm), lambda i: (0, i))

    def const_spec(a):
        nd = a.ndim
        return pl.BlockSpec(a.shape, lambda i, _nd=nd: (0,) * _nd)

    flops = 2 * M * L * width + 2 * M * width * width + head_flops
    cost = pl.CostEstimate(flops=int(flops), transcendentals=0,
                           bytes_accessed=int(2 * M * L * 4 + weight_bytes))

    outT = pl.pallas_call(
        functools.partial(_nbeats_kernel, two_stage, cdt),
        grid=grid,
        in_specs=[stream_spec()] + [const_spec(w) for w in weights],
        out_specs=stream_spec(),
        out_shape=jax.ShapeDtypeStruct((L, M), x_past.dtype),
        input_output_aliases={0: 0},       # out^T reuses the x^T temporary
        compiler_params=pltpu.CompilerParams(
            dimension_semantics=("parallel",),
            vmem_limit_bytes=vmem_limit,
        ),
        cost_estimate=cost,
    )(xT, *weights)

    return outT.T.reshape(B, N, L)


# --------------------------------------------------------------------------- #
# Pure-JAX reference (unfolded math, matches the PyTorch module in eval mode)
# --------------------------------------------------------------------------- #
def nbeats_forward_ref(x_past, params, window_size):
    B, N, L = x_past.shape
    x = x_past[:, :, :window_size].reshape(B * N, window_size)

    def fc(h, w, b, bn):
        h = h @ w + b
        g, be, rm, rv = bn[0:1], bn[1:2], bn[2:3], bn[3:4]
        h = (h - rm) / jnp.sqrt(rv + BN_EPS) * g + be
        return jnp.maximum(h, 0.0)

    h = fc(x, params["w1"], params["b1"], params["bn1"])
    h = fc(h, params["w2"], params["b2"], params["bn2"])
    backcast = (h @ params["wb"]) @ params["basis_b"]
    forecast = (h @ params["wf"]) @ params["basis_f"]
    block_out = jnp.concatenate([-backcast, forecast], axis=-1).reshape(B, N, L)
    return block_out + x_past


# --------------------------------------------------------------------------- #
# Parameter init (raw, unfolded — folding/composition happens in the wrapper)
# --------------------------------------------------------------------------- #
def init_params(key, window_size, horizon, width, thetas_dim):
    ks = jax.random.split(key, 12)

    def linear_w(k, fan_in, fan_out):
        bound = 1.0 / jnp.sqrt(fan_in)
        return jax.random.uniform(k, (fan_in, fan_out), jnp.float32, -bound, bound)

    def linear_b(k, fan_in, fan_out):
        bound = 1.0 / jnp.sqrt(fan_in)
        return jax.random.uniform(k, (1, fan_out), jnp.float32, -bound, bound)

    def bn_pack(k, n):
        k1, k2, k3, k4 = jax.random.split(k, 4)
        gamma = jax.random.uniform(k1, (1, n), jnp.float32, 0.5, 1.5)
        beta = 0.1 * jax.random.normal(k2, (1, n), jnp.float32)
        rmean = 0.1 * jax.random.normal(k3, (1, n), jnp.float32)
        rvar = jax.random.uniform(k4, (1, n), jnp.float32, 0.5, 1.5)
        return jnp.concatenate([gamma, beta, rmean, rvar], axis=0)   # (4, n)

    def poly_basis(length):
        t = jnp.arange(length, dtype=jnp.float32) / float(length)
        i = jnp.arange(thetas_dim, dtype=jnp.float32)
        return t[None, :] ** i[:, None]                              # (td, length)

    return {
        "w1": linear_w(ks[0], window_size, width),
        "b1": linear_b(ks[1], window_size, width),
        "bn1": bn_pack(ks[2], width),
        "w2": linear_w(ks[3], width, width),
        "b2": linear_b(ks[4], width, width),
        "bn2": bn_pack(ks[5], width),
        "wb": linear_w(ks[6], width, thetas_dim),
        "wf": linear_w(ks[7], width, thetas_dim),
        "basis_b": poly_basis(window_size),
        "basis_f": poly_basis(horizon),
    }


if __name__ == "__main__":
    # Small shapes consistent with the module's forward.  M = B*N = 520 so the
    # lane grid has 5 steps (128-wide blocks) including a ragged last block.
    B, N = 8, 65
    window_size, horizon = 8, 4        # L = W + H = 12
    width, thetas_dim = 32, 4          # small trend polynomial (degree 3)

    key = jax.random.PRNGKey(0)
    kx, kp = jax.random.split(key)
    x_past = jax.random.normal(kx, (B, N, window_size + horizon), jnp.float32)
    params = init_params(kp, window_size, horizon, width, thetas_dim)

    ref = nbeats_forward_ref(x_past, params, window_size)

    # Main path: bf16 MXU inputs, f32 accumulation, auto head selection (jitted).
    fwd = jax.jit(functools.partial(nbeats_forward_pallas,
                                    window_size=window_size))
    out = jax.block_until_ready(fwd(x_past, params))
    assert out.shape == x_past.shape and out.dtype == x_past.dtype
    assert jnp.allclose(out, ref, rtol=5e-2, atol=5e-2), \
        "bf16 kernel mismatch vs JAX reference"

    # f32 MXU path, both head forms; only BN-fold / rounding-order differences.
    for mode in ("fused", "two_stage"):
        out32 = jax.block_until_ready(
            nbeats_forward_pallas(x_past, params, window_size,
                                  use_bf16=False, head_mode=mode))
        assert jnp.allclose(out32, ref, rtol=5e-3, atol=5e-3), \
            f"f32 kernel ({mode}) mismatch vs JAX reference"

    print("KERNEL_OK")
</pallas_src>

<mosaic_0001>
module attributes {stable_mosaic.version = 11 : i64} {
  func.func @_nbeats_kernel(%arg0: i32, %arg1: memref<12x128xf32, #tpu.memory_space<vmem>>, %arg2: memref<32x12xbf16, #tpu.memory_space<vmem>>, %arg3: memref<32x1xf32, #tpu.memory_space<vmem>>, %arg4: memref<32x32xbf16, #tpu.memory_space<vmem>>, %arg5: memref<32x1xf32, #tpu.memory_space<vmem>>, %arg6: memref<8x32xbf16, #tpu.memory_space<vmem>>, %arg7: memref<12x8xbf16, #tpu.memory_space<vmem>>, %arg8: memref<12x128xf32, #tpu.memory_space<vmem>>) attributes {dimension_semantics = [#tpu.dimension_semantics<parallel>], iteration_bounds = array<i64: 5>, scalar_prefetch = 0 : i64, scratch_operands = 0 : i64, tpu.core_type = #tpu.core_type<tc>, window_params = [{transform_indices = @transform_0, window_bounds = array<i64: 12, 128>}, {pipeline_mode = #tpu.pipeline_mode<synchronous>, transform_indices = @transform_1, window_bounds = array<i64: 32, 12>}, {pipeline_mode = #tpu.pipeline_mode<synchronous>, transform_indices = @transform_2, window_bounds = array<i64: 32, 1>}, {pipeline_mode = #tpu.pipeline_mode<synchronous>, transform_indices = @transform_3, window_bounds = array<i64: 32, 32>}, {pipeline_mode = #tpu.pipeline_mode<synchronous>, transform_indices = @transform_4, window_bounds = array<i64: 32, 1>}, {pipeline_mode = #tpu.pipeline_mode<synchronous>, transform_indices = @transform_5, window_bounds = array<i64: 8, 32>}, {pipeline_mode = #tpu.pipeline_mode<synchronous>, transform_indices = @transform_6, window_bounds = array<i64: 12, 8>}, {transform_indices = @transform_7, window_bounds = array<i64: 12, 128>}]} {
    %c0 = arith.constant 0 : index
    %c0_0 = arith.constant 0 : index
    %0 = vector.load %arg1[%c0, %c0_0] : memref<12x128xf32, #tpu.memory_space<vmem>>, vector<12x128xf32>
    %c0_1 = arith.constant 0 : index
    %c0_2 = arith.constant 0 : index
    %1 = vector.load %arg2[%c0_1, %c0_2] : memref<32x12xbf16, #tpu.memory_space<vmem>>, vector<32x12xbf16>
    %2 = arith.truncf %0 : vector<12x128xf32> to vector<12x128xbf16>
    %cst = arith.constant dense<0.000000e+00> : vector<32x128xf32>
    %3 = tpu.matmul %1, %2, %cst {dimension_numbers = #tpu.dot_dimension_numbers<[1], [0], [0], [1], [0, 0, 1, 1], [], []>} : vector<32x12xbf16>, vector<12x128xbf16>, vector<32x128xf32> -> vector<32x128xf32>
    %c0_3 = arith.constant 0 : index
    %c0_4 = arith.constant 0 : index
    %4 = vector.load %arg3[%c0_3, %c0_4] : memref<32x1xf32, #tpu.memory_space<vmem>>, vector<32x1xf32>
    %5 = vector.broadcast %4 : vector<32x1xf32> to vector<32x128xf32>
    %6 = arith.addf %3, %5 : vector<32x128xf32>
    %cst_5 = arith.constant 0.000000e+00 : f32
    %7 = vector.broadcast %cst_5 : f32 to vector<32x128xf32>
    %8 = arith.maximumf %6, %7 : vector<32x128xf32>
    %c0_6 = arith.constant 0 : index
    %c0_7 = arith.constant 0 : index
    %9 = vector.load %arg4[%c0_6, %c0_7] : memref<32x32xbf16, #tpu.memory_space<vmem>>, vector<32x32xbf16>
    %10 = arith.truncf %8 : vector<32x128xf32> to vector<32x128xbf16>
    %cst_8 = arith.constant dense<0.000000e+00> : vector<32x128xf32>
    %11 = tpu.matmul %9, %10, %cst_8 {dimension_numbers = #tpu.dot_dimension_numbers<[1], [0], [0], [1], [0, 0, 1, 1], [], []>} : vector<32x32xbf16>, vector<32x128xbf16>, vector<32x128xf32> -> vector<32x128xf32>
    %c0_9 = arith.constant 0 : index
    %c0_10 = arith.constant 0 : index
    %12 = vector.load %arg5[%c0_9, %c0_10] : memref<32x1xf32, #tpu.memory_space<vmem>>, vector<32x1xf32>
    %13 = vector.broadcast %12 : vector<32x1xf32> to vector<32x128xf32>
    %14 = arith.addf %11, %13 : vector<32x128xf32>
    %cst_11 = arith.constant 0.000000e+00 : f32
    %15 = vector.broadcast %cst_11 : f32 to vector<32x128xf32>
    %16 = arith.maximumf %14, %15 : vector<32x128xf32>
    %17 = arith.truncf %16 : vector<32x128xf32> to vector<32x128xbf16>
    %c0_12 = arith.constant 0 : index
    %c0_13 = arith.constant 0 : index
    %18 = vector.load %arg6[%c0_12, %c0_13] : memref<8x32xbf16, #tpu.memory_space<vmem>>, vector<8x32xbf16>
    %cst_14 = arith.constant dense<0.000000e+00> : vector<8x128xf32>
    %19 = tpu.matmul %18, %17, %cst_14 {dimension_numbers = #tpu.dot_dimension_numbers<[1], [0], [0], [1], [0, 0, 1, 1], [], []>} : vector<8x32xbf16>, vector<32x128xbf16>, vector<8x128xf32> -> vector<8x128xf32>
    %20 = arith.truncf %19 : vector<8x128xf32> to vector<8x128xbf16>
    %c0_15 = arith.constant 0 : index
    %c0_16 = arith.constant 0 : index
    %21 = vector.load %arg7[%c0_15, %c0_16] : memref<12x8xbf16, #tpu.memory_space<vmem>>, vector<12x8xbf16>
    %cst_17 = arith.constant dense<0.000000e+00> : vector<12x128xf32>
    %22 = tpu.matmul %21, %20, %cst_17 {dimension_numbers = #tpu.dot_dimension_numbers<[1], [0], [0], [1], [0, 0, 1, 1], [], []>} : vector<12x8xbf16>, vector<8x128xbf16>, vector<12x128xf32> -> vector<12x128xf32>
    %23 = arith.addf %22, %0 : vector<12x128xf32>
    %c0_18 = arith.constant 0 : index
    %c0_19 = arith.constant 0 : index
    %24 = vector.load %arg8[%c0_18, %c0_19] : memref<12x128xf32, #tpu.memory_space<vmem>>, vector<12x128xf32>
    tpu.vector_store %arg8[%c0_18, %c0_19], %23 {strides = array<i32>} : memref<12x128xf32, #tpu.memory_space<vmem>>, vector<12x128xf32>,
    return
  }
  func.func @transform_0(%arg0: i32) -> (i32, i32) {
    %c0_i32 = arith.constant 0 : i32
    %c0_i32_0 = arith.constant 0 : i32
    return %c0_i32, %arg0 : i32, i32
  }
  func.func @transform_1(%arg0: i32) -> (i32, i32) {
    %c0_i32 = arith.constant 0 : i32
    %c0_i32_0 = arith.constant 0 : i32
    %c0_i32_1 = arith.constant 0 : i32
    return %c0_i32, %c0_i32_0 : i32, i32
  }
  func.func @transform_2(%arg0: i32) -> (i32, i32) {
    %c0_i32 = arith.constant 0 : i32
    %c0_i32_0 = arith.constant 0 : i32
    %c0_i32_1 = arith.constant 0 : i32
    return %c0_i32, %c0_i32_0 : i32, i32
  }
  func.func @transform_3(%arg0: i32) -> (i32, i32) {
    %c0_i32 = arith.constant 0 : i32
    %c0_i32_0 = arith.constant 0 : i32
    %c0_i32_1 = arith.constant 0 : i32
    return %c0_i32, %c0_i32_0 : i32, i32
  }
  func.func @transform_4(%arg0: i32) -> (i32, i32) {
    %c0_i32 = arith.constant 0 : i32
    %c0_i32_0 = arith.constant 0 : i32
    %c0_i32_1 = arith.constant 0 : i32
    return %c0_i32, %c0_i32_0 : i32, i32
  }
  func.func @transform_5(%arg0: i32) -> (i32, i32) {
    %c0_i32 = arith.constant 0 : i32
    %c0_i32_0 = arith.constant 0 : i32
    %c0_i32_1 = arith.constant 0 : i32
    return %c0_i32, %c0_i32_0 : i32, i32
  }
  func.func @transform_6(%arg0: i32) -> (i32, i32) {
    %c0_i32 = arith.constant 0 : i32
    %c0_i32_0 = arith.constant 0 : i32
    %c0_i32_1 = arith.constant 0 : i32
    return %c0_i32, %c0_i32_0 : i32, i32
  }
  func.func @transform_7(%arg0: i32) -> (i32, i32) {
    %c0_i32 = arith.constant 0 : i32
    %c0_i32_0 = arith.constant 0 : i32
    return %c0_i32, %arg0 : i32, i32
  }
}

</mosaic_0001>

<bundles_post_ra>
// kernel: nbeats_forward_pallas.1
= control target key start
LH: loop header
LB: loop body
LE: loop exit
PB: predicated region body
PF: predicated region fallthrough
CT: control target
= control target key end

     0   :  { %s889_s24 = smov 0   ;;  %s891_s25 = smov 0   ;;  %s1008_s0 = inlined_call_operand.vmem [shape: f32[12,520], index: 0, kind: input, shape index: {}, may-alias: {0,7}]   ;;  %s1009_s1 = inlined_call_operand.vmem [shape: bf16[32,12], index: 1, kind: input, shape index: {}]   ;;  %s1010_s2 = inlined_call_operand.vmem [shape: f32[32,1], index: 2, kind: input, shape index: {}]   ;;  %s1011_s3 = inlined_call_operand.vmem [shape: bf16[32,32], index: 3, kind: input, shape index: {}]   ;;  %s1012_s4 = inlined_call_operand.vmem [shape: f32[32,1], index: 4, kind: input, shape index: {}]   ;;  %s1013_s5 = inlined_call_operand.vmem [shape: bf16[8,32], index: 5, kind: input, shape index: {}]   ;;  %s1014_s6 = inlined_call_operand.vmem [shape: bf16[12,8], index: 6, kind: input, shape index: {}]   ;;  %s1015_s7 = inlined_call_operand.vmem [shape: f32[12,520], index: 7, kind: output, shape index: {}, may-alias: {0,7}]  }
   0x1   :  { %s893_s26 = smov 0  }
   0x2 LB: > { %s723_s27 = sadd.s32 4294967295, %s844_s26   ;;  %s906_s28 = sadd.s32 1, %s844_s26   ;;  %s844_s26 = sphi %s893_s26, %s1019_s26   ;;  %s840_s25 = sphi %s891_s25, %s1018_s25   ;;  %s836_s24 = sphi %s889_s24, %s1017_s24  }
   0x3   : > { %s21_s29 = ssub.s32 %s844_s26, %s906_s28  ;;  %s24_s30 = sadd.s32 1, %s840_s25 }
   0x4   : > { %p22_p0 = scmp.eq.s32.totalorder %s21_s29, 0  ;;  %p31_p1 = scmp.ne.s32.totalorder %s840_s25, %s836_s24 }
   0x5   : > { %p32_p2 = scmp.eq.s32.totalorder %s844_s26, 0  ;;  %p187_p3 = scmp.eq.s32.totalorder %s723_s27, 4 }
   0x6   : > { %s917_s8 = scalar_select %p22_p0, %s840_s25, %s24_s30  }
   0x7   : > { %p33_p4 = por %p32_p2, %p31_p1  ;;  %p919_p5 = por %p187_p3, %p31_p1 }
   0x8   : > { %p726_p6 = scmp.ge.s32.totalorder %s844_s26, 5 }
   0xa   : > { %227 = sbr.rel (%p726_p6) target bundleno = 24 (0x18), region = 40 }
  0x11   : > { %230 = sbr.rel (!%p33_p4) target bundleno = 24 (0x18), region = 44  ;;  %s232_s10 = sand.u32 (%p33_p4), 1, %s840_s25  }
  0x12   : > { %s728_s11 = sshll.u32 (%p33_p4), %s844_s26, 3  ;;  %s727_s12 = sshll.u32 (%p33_p4), %s232_s10, 4 }
  0x13   : > { %s236_s15 = scalar_lea.vmem (%p33_p4), %s1008_s0, %s728_s11  ;;  %s234_s16 = scalar_lea.vmem (%p33_p4), [#allocation2], %s727_s12 }
  0x14   : > { %v266_v0 = vld [vmem:[%s236_s15] sm:$0xff] (%p33_p4)  ;;  %v268_v1 = vld [vmem:[%s236_s15 + $0x28] sm:$0xff] (%p33_p4) }
  0x15   : > { %267 = vst [vmem:[%s234_s16] sm:$0xff] (%p33_p4), %v266_v0  ;;  %269 = vst [vmem:[%s234_s16 + $0x8] sm:$0xff] (%p33_p4), %v268_v1 }
  0x18 PF: > { %p729_p7 = scmp.ge.s32.totalorder %s844_s26, 1  ;;  %p274_p8 = scmp.lt.s32.totalorder %s844_s26, 6 }
  0x1a   : > { %p275_p9 = pnand %p729_p7, %p274_p8 }
  0x1b   : > { %s281_s17 = sand.u32 (!%p275_p9), 1, %s836_s24   ;;  %v817_v2 = vld [vmem:[%s1009_s1] sm:$0xff] (!%p275_p9)   ;;  %vm353_vm0 = vcmask (!%p275_p9), 97280   ;;  %v321_v4 = vld [vmem:[%s1010_s2 + $0x10] sm:$0xff] (!%p275_p9)  ;;  %vm360_vm1 = vcmask (!%p275_p9), 1045504   ;;  %v846_v7 = vmov (!%p275_p9), 0  }
  0x1c   : > { %278 = sbr.rel (%p275_p9) target bundleno = 937 (0x3a9), region = 82  ;;  %s932_s18 = sshll.u32 (!%p275_p9), %s281_s17, 4  ;;  %v319_v3 = vld [vmem:[%s1010_s2] sm:$0xff] (!%p275_p9)  ;;  %761 = vmatprep.mubr.msk.bf16.mxu0 (!%p275_p9), %vm353_vm0, %v817_v2  ;;  %815 = vset.pattern.permute.xlu0 (!%p275_p9), %v846_v7  ;;  %v818_v9 = vld [vmem:[%s1009_s1 + $0x8] sm:$0xff] (!%p275_p9)   ;;  %v322_v12 = vld [vmem:[%s1010_s2 + $0x18] sm:$0xff] (!%p275_p9)  ;;  %vm457_vm2 = vcmask (!%p275_p9), 261120  }
  0x1d   : > { %s283_s30 = scalar_lea.vmem (!%p275_p9), [#allocation2], %s932_s18  ;;  %325 = vperm.xlu0 (!%p275_p9), %815, %v319_v3   ;;  %816 = vset.pattern.permute.xlu1 (!%p275_p9), %v846_v7  ;;  %v320_v10 = vld [vmem:[%s1010_s2 + $0x8] sm:$0xff] (!%p275_p9)  ;;  %v423_v13 = vld [vmem:[%s1012_s4] sm:$0xff] (!%p275_p9)  ;;  %v425_v15 = vld [vmem:[%s1012_s4 + $0x10] sm:$0xff] (!%p275_p9)  ;;  %v847_v37 = vmov (!%p275_p9), 0.0   ;;  %vm848_vm3 = vmmov (!%p275_p9), 0  }
  0x1e   : > { %v944_v5 = vld [vmem:[%s283_s30] sm:$0xff] (!%p275_p9)  ;;  %v946_v6 = vld [vmem:[%s283_s30 + $0x8] sm:$0xf] (!%p275_p9)  ;;  %335 = vperm.xlu1 (!%p275_p9), %816, %v321_v4   ;;  %vm575_vm4 = vcmask (!%p275_p9), 1043456   ;;  %vm571_vm5 = vcmask (!%p275_p9), 64512   ;;  %s310_s15 = scalar_lea.vmem (!%p275_p9), [#allocation3], %s932_s18 }
  0x1f   : > { %v318_v8 = vpack.c.bf16 (!%p275_p9), %v946_v6, %v944_v5  ;;  %v424_v14 = vld [vmem:[%s1012_s4 + $0x8] sm:$0xff] (!%p275_p9)  ;;  %v426_v16 = vld [vmem:[%s1012_s4 + $0x18] sm:$0xff] (!%p275_p9)  ;;  %v819_v17 = vld [vmem:[%s1011_s3] sm:$0xff] (!%p275_p9)  }
  0x20   : > { %769 = vmatprep.mubr.msk.bf16.mxu1 (!%p275_p9), %vm457_vm2, %v819_v17  ;;  %v820_v36 = vld [vmem:[%s1011_s3 + $0x8] sm:$0xff] (!%p275_p9)   ;;  %v519_v56 = vld [vmem:[%s1013_s5] sm:$0xf] (!%p275_p9) }
  0x21   : > { %787 = vmatprep.subr.msk.bf16.mxu0 (!%p275_p9), %vm360_vm1, %v318_v8  ;;  %v362_v11 = vsel (!%p275_p9), %vm360_vm1, %v318_v8, 0  ;;  %330 = vperm.xlu0 (!%p275_p9), %815, %v320_v10   ;;  %v821_v63 = vld [vmem:[%s1014_s6] sm:$0x3f] (!%p275_p9)  }
  0x22   : > { %760 = vmatpush3.bf16.msra.mxu0 (!%p275_p9), %v362_v11  ;;  %340 = vperm.xlu1 (!%p275_p9), %816, %v322_v12  }
  0x23   : > { %773 = vmatprep.subr.bf16.mxu0 %v847_v37  ;;  %s744_s16 = sshll.u32 (%p919_p5), %s723_s27, 3 }
  0x24   : > { %s630_s20 = scalar_lea.vmem (%p919_p5), %s1015_s7, %s744_s16 }
  0x25   : > { %762 = vmatmul.mubr.msk.bf16.vlgmr.msra.gmra.mrb[0].mxu0 %vm353_vm0, %v818_v9  ;;  %429 = vperm.xlu0 %815, %v423_v13  }
  0x26   : > { %434 = vperm.xlu1 %816, %v424_v14   ;;  %777 = vmatprep.mubr.msk.bf16.mxu0 %vm848_vm3, %v847_v37 }
  0x29   : > { %439 = vperm.xlu0 %815, %v425_v15  }
  0x2a   : > { %444 = vperm.xlu1 %816, %v426_v16  }
  0x9c   : > { %v326_v19 = vpop.permute.xlu0 %325 }
  0x9d   : > { %v336_v18 = vpop.permute.xlu1 %335 }
  0xa0   : > { %v331_v26 = vpop.permute.xlu0 %330 }
  0xa1   : > { %v341_v23 = vpop.permute.xlu1 %340 }
  0xa4   : > { %v430_v38 = vpop.permute.xlu0 %429 }
  0xa5   : > { %v435_v39 = vpop.permute.xlu1 %434 }
  0xa8   : > { %v440_v40 = vpop.permute.xlu0 %439 }
  0xa9   : > { %v445_v44 = vpop.permute.xlu1 %444 }
  0xf8   : > { %v763_v20 = vpop.f32.mrb[0].mxu0 }
  0xf9   : > { %v407_v21 = vadd.f32 %v763_v20, %v336_v18  ;;  %v398_v22 = vpop.f32.mrb[1].mxu0 }
  0xfa   : > { %v399_v24 = vadd.f32 %v398_v22, %v326_v19  ;;  %v764_v25 = vpop.f32.mrb[2].mxu0 }
  0xfb   : > { %v410_v27 = vadd.f32 %v764_v25, %v341_v23  ;;  %v401_v28 = vpop.f32.mrb[3].mxu0  ;;  %v415_v30 = vmax.f32 %v407_v21, 0.0 }
  0xfc   : > { %v402_v29 = vadd.f32 %v401_v28, %v331_v26  ;;  %v413_v32 = vmax.f32 %v399_v24, 0.0 }
  0xfd   : > { %v416_v31 = vmax.f32 %v410_v27, 0.0 }
  0xfe   : > { %v414_v33 = vmax.f32 %v402_v29, 0.0 }
  0xff   : > { %v422_v34 = vpack.c.bf16 %v416_v31, %v415_v30 }
 0x100   : > { %v421_v35 = vpack.c.bf16 %v414_v33, %v413_v32 }
 0x102   : > { %765 = vmatprep.subr.bf16.mxu1 %v421_v35 }
 0x103   : > { %766 = vmatpush3.bf16.msra.mxu1 %v421_v35 }
 0x104   : > { %767 = vmatprep.subr.bf16.mxu1 %v422_v34 }
 0x107   : > { %768 = vmatpush3.bf16.msra.mxu1 %v422_v34 }
 0x108   : > { %781 = vmatprep.subr.bf16.mxu1 %v847_v37 }
 0x10a   : > { %770 = vmatmul.mubr.msk.bf16.vlgmr.msra.gmra.mrb[0].mxu1 %vm457_vm2, %v820_v36 }
 0x10b   : > { %783 = vmatprep.mubr.msk.bf16.mxu1 %vm848_vm3, %v847_v37 }
 0x1dd   : > { %v771_v41 = vpop.f32.mrb[0].mxu1 }
 0x1de   : > { %v507_v42 = vadd.f32 %v771_v41, %v440_v40  ;;  %v498_v43 = vpop.f32.mrb[1].mxu1 }
 0x1df   : > { %v499_v45 = vadd.f32 %v498_v43, %v430_v38  ;;  %v772_v46 = vpop.f32.mrb[2].mxu1 }
 0x1e0   : > { %v510_v47 = vadd.f32 %v772_v46, %v445_v44  ;;  %v501_v48 = vpop.f32.mrb[3].mxu1  ;;  %v515_v50 = vmax.f32 %v507_v42, 0.0 }
 0x1e1   : > { %v502_v49 = vadd.f32 %v501_v48, %v435_v39  ;;  %v513_v52 = vmax.f32 %v499_v45, 0.0 }
 0x1e2   : > { %v516_v51 = vmax.f32 %v510_v47, 0.0 }
 0x1e3   : > { %v514_v53 = vmax.f32 %v502_v49, 0.0 }
 0x1e4   : > { %v518_v54 = vpack.c.bf16 %v516_v51, %v515_v50 }
 0x1e5   : > { %v517_v55 = vpack.c.bf16 %v514_v53, %v513_v52 }
 0x1e7   : > { %774 = vmatpush3.bf16.msra.mxu0 %v517_v55 }
 0x1e8   : > { %775 = vmatprep.subr.bf16.mxu0 %v847_v37 }
 0x1eb   : > { %776 = vmatpush3.bf16.msra.mxu0 %v518_v54 }
 0x1ee   : > { %778 = vmatmul.mubr.msk.bf16.vlgmr.msra.gmra.mrb[4].mxu0 %vm457_vm2, %v519_v56 }
 0x2c1   : > { %v557_v57 = vpop.f32.mrb[4].mxu0 }
 0x2c2   : > { %v563_v58 = vpack.c.bf16 %v557_v57, %v557_v57  ;;  %v779_v59 = vpop.f32.mrb[5].mxu0 }
 0x2c3   : > { %v560_v60 = vpop.f32.mrb[6].mxu0 }
 0x2c4   : > { %v577_v61 = vsel %vm575_vm4, %v563_v58, 0  ;;  %v780_v62 = vpop.f32.mrb[7].mxu0 }
 0x2c5   : > { %782 = vmatpush3.bf16.msra.mxu1 %v577_v61 }
 0x2c8   : > { %784 = vmatmul.mubr.msk.bf16.vlgmr.msra.gmra.mrb[4].mxu1 %vm571_vm5, %v821_v63 }
 0x39a   : > { %628 = sbr.rel (!%p919_p5) target bundleno = 937 (0x3a9), region = 90 }
 0x39b   : > { %v613_v0 = vpop.f32.mrb[4].mxu1 }
 0x39c   : > { %v614_v1 = vadd.f32 %v613_v0, %v944_v5  ;;  %v785_v2 = vpop.f32.mrb[5].mxu1 }
 0x39d   : > { %v616_v3 = vpop.f32.mrb[6].mxu1 }
 0x39e   : > { %620 = vst [vmem:[%s310_s15] sm:$0xff] %v614_v1  ;;  %v617_v4 = vadd.f32 %v616_v3, %v946_v6  ;;  %v786_v7 = vpop.f32.mrb[7].mxu1 }
 0x3a0   : > { %621 = vst [vmem:[%s310_s15 + $0x8] sm:$0xf] %v617_v4 }
 0x3a5   : > { %v660_v8 = vld [vmem:[%s310_s15] sm:$0xff] }
 0x3a6   : > { %661 = vst [vmem:[%s630_s20] sm:$0xff] %v660_v8 }
 0x3a7   : > { %v662_v9 = vld [vmem:[%s310_s15 + $0x8] sm:$0xff] }
 0x3a8   : > { %663 = vst [vmem:[%s630_s20 + $0x28] sm:$0xff] %v662_v9 }
 0x3a9 PF: > { %p14_p10 = scmp.ge.s32.totalorder %s906_s28, 7   ;;  %s1017_s24 = smov %s840_s25 }
 0x3aa   : > { %s1018_s25 = smov %s917_s8  ;;  %s1019_s26 = smov %s906_s28 }
 0x3ab   :  { %16 = sbr.rel (!%p14_p10) target bundleno = 2 (0x2), region = 159 }

</bundles_post_ra>
